<compile_context>
chip_gen: v7x
topology: tpu7x:2x2x1
jax: 0.10.0
libtpu: 0.0.40
codegen_flags: <defaults>
</compile_context>

<pallas_src>
import functools

import jax
import jax.numpy as jnp
from jax import lax
from jax.experimental import pallas as pl
from jax.experimental.pallas import tpu as pltpu

EPS = 1e-8  # matches register_buffer('eps', torch.tensor(1e-08))
LANES = 128
SUBLANES = 8


def _accumulate_block(x_ref, t_ref, num_chunks, chunk_rows, unroll,
                      row0=None, valid_rows=None):
    """Sum diff^2 and |diff| over the block, one (chunk_rows,128) slice at a time.

    All intermediates stay in vregs; returns a pair of (8,128) f32 partials.
    When row0/valid_rows are given, rows at-or-past valid_rows are zeroed
    BEFORE squaring/abs so DMA-padded garbage never reaches the accumulators.
    """
    masked = row0 is not None

    def body(k, carry):
        sq_acc, abs_acc = carry
        r = pl.multiple_of(k * chunk_rows, chunk_rows)
        xs = x_ref[pl.ds(r, chunk_rows), :].astype(jnp.float32)
        ts = t_ref[pl.ds(r, chunk_rows), :].astype(jnp.float32)
        d = xs - ts
        if masked:
            local = lax.broadcasted_iota(jnp.int32, (chunk_rows, LANES), 0)
            d = jnp.where(row0 + r + local < valid_rows, d, 0.0)
        return sq_acc + d * d, abs_acc + jnp.abs(d)

    zeros = jnp.zeros((chunk_rows, LANES), jnp.float32)
    sq, ab = lax.fori_loop(0, num_chunks, body, (zeros, zeros), unroll=unroll)

    if chunk_rows != SUBLANES:
        # Fold the (chunk_rows,128) register accumulators down to (8,128);
        # tiny (<= a few vregs), pure VPU adds.
        sq = jnp.sum(sq.reshape(chunk_rows // SUBLANES, SUBLANES, LANES), axis=0)
        ab = jnp.sum(ab.reshape(chunk_rows // SUBLANES, SUBLANES, LANES), axis=0)
    return sq, ab


def _scaled_mse_kernel(x_ref, t_ref, sq_out_ref, abs_out_ref, *,
                       tile_rows, chunk_rows, blocks_per_shard, valid_rows,
                       needs_mask, unroll):
    c = pl.program_id(0)  # shard axis (parallel / core_parallel)
    i = pl.program_id(1)  # reduction steps within a shard (arbitrary, last)

    @pl.when(i == 0)
    def _():
        sq_out_ref[...] = jnp.zeros_like(sq_out_ref)
        abs_out_ref[...] = jnp.zeros_like(abs_out_ref)

    num_chunks = tile_rows // chunk_rows

    if not needs_mask:
        sq, ab = _accumulate_block(x_ref, t_ref, num_chunks, chunk_rows, unroll)
        sq_out_ref[0] += sq
        abs_out_ref[0] += ab
    else:
        # Global (unclamped) block index; the in_spec clamps the DMA to stay
        # in bounds, the row mask zeroes anything past the valid range
        # (ragged last block and duplicated out-of-range shard steps).
        row0 = (c * blocks_per_shard + i) * tile_rows
        full_block = row0 + tile_rows <= valid_rows

        @pl.when(full_block)
        def _():
            sq, ab = _accumulate_block(x_ref, t_ref, num_chunks, chunk_rows,
                                       unroll)
            sq_out_ref[0] += sq
            abs_out_ref[0] += ab

        @pl.when(jnp.logical_not(full_block))
        def _():
            sq, ab = _accumulate_block(x_ref, t_ref, num_chunks, chunk_rows,
                                       unroll, row0=row0, valid_rows=valid_rows)
            sq_out_ref[0] += sq
            abs_out_ref[0] += ab


def scaled_mse_loss(x, target, eps=EPS, tile_rows=None, num_shards=1,
                    core_parallel=False, vmem_limit_bytes=None):
    """sum((x-t)^2) / (sum(|x-t|) + eps), streamed through a Pallas kernel.

    num_shards / core_parallel: leave at (1, False) on single-TC chips
    (v5e/v6e); use (2, True) on v7x so the shard axis lands on both TCs.
    """
    assert x.shape == target.shape, "input/target must have the same shape"

    x_flat = jnp.ravel(x)
    t_flat = jnp.ravel(target)
    n = x_flat.shape[0]
    assert n > 0

    # Lane-unaligned tail (<=127 elements): handled in the tiny JAX epilogue
    # instead of padding/copying the whole tensors in HBM.
    n_main = (n // LANES) * LANES
    if n_main < n:
        dt = x_flat[n_main:].astype(jnp.float32) - t_flat[n_main:].astype(jnp.float32)
        sq_tail = jnp.sum(dt * dt)
        abs_tail = jnp.sum(jnp.abs(dt))
    else:
        sq_tail = jnp.float32(0.0)
        abs_tail = jnp.float32(0.0)

    if n_main == 0:  # tiny input, no kernel needed
        return sq_tail / (abs_tail + jnp.float32(eps))

    rows = n_main // LANES
    x2d = x_flat[:n_main].reshape(rows, LANES)
    t2d = t_flat[:n_main].reshape(rows, LANES)

    itemsize = jnp.dtype(x.dtype).itemsize
    # Chunk of rows processed per loop iteration inside the kernel:
    # 8 for f32, 16 for bf16, 32 for 1-byte types (native sublane packing).
    chunk_rows = SUBLANES * max(1, 4 // itemsize)

    if tile_rows is None:
        # ~8 MiB for the double-buffered inputs (2 inputs x 2 buffers): safe
        # under v5e's 16 MiB and v7x's 32 MiB default scoped VMEM.
        budget = 8 * 1024 * 1024
        tile_rows = budget // (2 * 2 * LANES * itemsize)
    tile_rows = int(tile_rows)
    tile_rows = min(tile_rows, pl.cdiv(rows, chunk_rows) * chunk_rows)
    tile_rows = max(chunk_rows, (tile_rows // chunk_rows) * chunk_rows)

    num_blocks = pl.cdiv(rows, tile_rows)
    num_shards = max(1, min(int(num_shards), num_blocks))
    blocks_per_shard = pl.cdiv(num_blocks, num_shards)

    has_oob_steps = num_shards * blocks_per_shard != num_blocks
    needs_mask = (num_blocks * tile_rows != rows) or has_oob_steps

    if has_oob_steps:
        # Clamp so the auto-pipelined DMA never leaves the array; the kernel
        # fully masks those duplicated blocks.
        def in_index_map(c, i):
            return (jnp.minimum(c * blocks_per_shard + i, num_blocks - 1), 0)
    else:
        def in_index_map(c, i):
            return (c * blocks_per_shard + i, 0)

    in_spec = pl.BlockSpec((tile_rows, LANES), in_index_map)
    out_spec = pl.BlockSpec((1, SUBLANES, LANES), lambda c, i: (c, 0, 0))

    kernel = functools.partial(
        _scaled_mse_kernel,
        tile_rows=tile_rows,
        chunk_rows=chunk_rows,
        blocks_per_shard=blocks_per_shard,
        valid_rows=rows,
        needs_mask=needs_mask,
        unroll=max(1, min(8, tile_rows // chunk_rows)),
    )

    shard_sem = pltpu.CORE_PARALLEL if core_parallel else pltpu.PARALLEL
    cp_kwargs = dict(dimension_semantics=(shard_sem, pltpu.ARBITRARY))
    if vmem_limit_bytes is not None:
        cp_kwargs["vmem_limit_bytes"] = int(vmem_limit_bytes)

    sq_parts, abs_parts = pl.pallas_call(
        kernel,
        out_shape=(
            jax.ShapeDtypeStruct((num_shards, SUBLANES, LANES), jnp.float32),
            jax.ShapeDtypeStruct((num_shards, SUBLANES, LANES), jnp.float32),
        ),
        grid_spec=pltpu.PrefetchScalarGridSpec(
            num_scalar_prefetch=0,
            grid=(num_shards, blocks_per_shard),
            in_specs=[in_spec, in_spec],
            out_specs=(out_spec, out_spec),
        ),
        compiler_params=pltpu.CompilerParams(**cp_kwargs),
    )(x2d, t2d)

    # Tiny epilogue: one cross-lane reduce + divide over (num_shards, 8, 128),
    # plus the <=127-element tail contribution.
    sq_total = jnp.sum(sq_parts) + sq_tail
    abs_total = jnp.sum(abs_parts) + abs_tail
    return sq_total / (abs_total + jnp.float32(eps))


def content_loss(inp, target, eps=EPS, **kwargs):
    """ContentLoss.forward(input) with a captured `target` buffer."""
    return scaled_mse_loss(inp, target, eps=eps, **kwargs)


def _reference(x, target, eps=EPS):
    diff = x - target
    return jnp.sum(diff ** 2) / (jnp.sum(jnp.abs(diff)) + eps)


if __name__ == "__main__":
    key = jax.random.PRNGKey(0)
    k1, k2, k3, k4, k5, k6 = jax.random.split(key, 6)

    # 1) Small NCHW feature maps as ContentLoss would see (lane-aligned,
    #    exact-fit path: no masking, no tail, default tile sizing).
    x = jax.random.normal(k1, (2, 4, 16, 16), dtype=jnp.float32)
    target = jax.random.normal(k2, (2, 4, 16, 16), dtype=jnp.float32)
    loss = content_loss(x, target)
    jax.block_until_ready(loss)
    ref = _reference(x, target)
    assert jnp.allclose(loss, ref, rtol=1e-5, atol=1e-6), (loss, ref)

    # 2) Lane-unaligned shape with a deliberately tiny tile + 2 shards:
    #    exercises the aligned-prefix kernel + JAX tail epilogue, the gated
    #    in-kernel ragged mask, and the clamped duplicated-block shard path.
    x2 = jax.random.normal(k3, (2, 3, 20, 24), dtype=jnp.float32)
    t2 = jax.random.normal(k4, (2, 3, 20, 24), dtype=jnp.float32)
    loss2 = scaled_mse_loss(x2, t2, tile_rows=8, num_shards=2)
    jax.block_until_ready(loss2)
    ref2 = _reference(x2, t2)
    assert jnp.allclose(loss2, ref2, rtol=1e-5, atol=1e-6), (loss2, ref2)

    # 3) bf16 inputs stream natively (half the HBM bytes); math stays f32.
    x3 = jax.random.normal(k5, (2, 8, 16, 16), dtype=jnp.float32).astype(jnp.bfloat16)
    t3 = jax.random.normal(k6, (2, 8, 16, 16), dtype=jnp.float32).astype(jnp.bfloat16)
    loss3 = scaled_mse_loss(x3, t3)
    jax.block_until_ready(loss3)
    ref3 = _reference(x3.astype(jnp.float32), t3.astype(jnp.float32))
    assert jnp.allclose(loss3, ref3, rtol=1e-5, atol=1e-5), (loss3, ref3)

    print("KERNEL_OK")
</pallas_src>

<mosaic_0001>
module attributes {stable_mosaic.version = 11 : i64} {
  func.func @_scaled_mse_kernel(%arg0: i32, %arg1: i32, %arg2: memref<16x128xf32, #tpu.memory_space<vmem>>, %arg3: memref<16x128xf32, #tpu.memory_space<vmem>>, %arg4: memref<1x8x128xf32, #tpu.memory_space<vmem>>, %arg5: memref<1x8x128xf32, #tpu.memory_space<vmem>>) attributes {dimension_semantics = [#tpu.dimension_semantics<parallel>, #tpu.dimension_semantics<arbitrary>], iteration_bounds = array<i64: 1, 1>, scalar_prefetch = 0 : i64, scratch_operands = 0 : i64, tpu.core_type = #tpu.core_type<tc>, window_params = [{transform_indices = @transform_0, window_bounds = array<i64: 16, 128>}, {transform_indices = @transform_1, window_bounds = array<i64: 16, 128>}, {transform_indices = @transform_2, window_bounds = array<i64: 1, 8, 128>}, {transform_indices = @transform_3, window_bounds = array<i64: 1, 8, 128>}]} {
    %c0_i32 = arith.constant 0 : i32
    %0 = arith.cmpi eq, %arg1, %c0_i32 : i32
    %1 = arith.extui %0 : i1 to i32
    %c0_i32_0 = arith.constant 0 : i32
    %2 = arith.cmpi ne, %1, %c0_i32_0 : i32
    scf.if %2 {
      %cst_18 = arith.constant 0.000000e+00 : f32
      %38 = vector.broadcast %cst_18 : f32 to vector<1x8x128xf32>
      %c0_19 = arith.constant 0 : index
      %c0_20 = arith.constant 0 : index
      %c0_21 = arith.constant 0 : index
      %39 = vector.load %arg4[%c0_19, %c0_20, %c0_21] : memref<1x8x128xf32, #tpu.memory_space<vmem>>, vector<1x8x128xf32>
      tpu.vector_store %arg4[%c0_19, %c0_20, %c0_21], %38 {strides = array<i32>} : memref<1x8x128xf32, #tpu.memory_space<vmem>>, vector<1x8x128xf32>,
      %cst_22 = arith.constant 0.000000e+00 : f32
      %40 = vector.broadcast %cst_22 : f32 to vector<1x8x128xf32>
      %c0_23 = arith.constant 0 : index
      %c0_24 = arith.constant 0 : index
      %c0_25 = arith.constant 0 : index
      %41 = vector.load %arg5[%c0_23, %c0_24, %c0_25] : memref<1x8x128xf32, #tpu.memory_space<vmem>>, vector<1x8x128xf32>
      tpu.vector_store %arg5[%c0_23, %c0_24, %c0_25], %40 {strides = array<i32>} : memref<1x8x128xf32, #tpu.memory_space<vmem>>, vector<1x8x128xf32>,
    } else {
    }
    %cst = arith.constant 0.000000e+00 : f32
    %3 = vector.broadcast %cst : f32 to vector<8x128xf32>
    %c0_i32_1 = arith.constant 0 : i32
    %c8_i32 = arith.constant 8 : i32
    %4 = arith.muli %c0_i32_1, %c8_i32 : i32
    %5 = tpu.assume_multiple %4, 8 : i32
    %6 = arith.index_cast %5 : i32 to index
    %c0 = arith.constant 0 : index
    %7 = vector.load %arg2[%6, %c0] : memref<16x128xf32, #tpu.memory_space<vmem>>, vector<8x128xf32>
    %8 = arith.index_cast %5 : i32 to index
    %c0_2 = arith.constant 0 : index
    %9 = vector.load %arg3[%8, %c0_2] : memref<16x128xf32, #tpu.memory_space<vmem>>, vector<8x128xf32>
    %10 = arith.subf %7, %9 : vector<8x128xf32>
    %11 = arith.mulf %10, %10 : vector<8x128xf32>
    %12 = arith.addf %3, %11 : vector<8x128xf32>
    %13 = math.absf %10 : vector<8x128xf32>
    %14 = arith.addf %3, %13 : vector<8x128xf32>
    %c1_i32 = arith.constant 1 : i32
    %c8_i32_3 = arith.constant 8 : i32
    %15 = arith.muli %c1_i32, %c8_i32_3 : i32
    %16 = tpu.assume_multiple %15, 8 : i32
    %17 = arith.index_cast %16 : i32 to index
    %c0_4 = arith.constant 0 : index
    %18 = vector.load %arg2[%17, %c0_4] : memref<16x128xf32, #tpu.memory_space<vmem>>, vector<8x128xf32>
    %19 = arith.index_cast %16 : i32 to index
    %c0_5 = arith.constant 0 : index
    %20 = vector.load %arg3[%19, %c0_5] : memref<16x128xf32, #tpu.memory_space<vmem>>, vector<8x128xf32>
    %21 = arith.subf %18, %20 : vector<8x128xf32>
    %22 = arith.mulf %21, %21 : vector<8x128xf32>
    %23 = arith.addf %12, %22 : vector<8x128xf32>
    %24 = math.absf %21 : vector<8x128xf32>
    %25 = arith.addf %14, %24 : vector<8x128xf32>
    %c2_i32 = arith.constant 2 : i32
    %c0_6 = arith.constant 0 : index
    %c0_7 = arith.constant 0 : index
    %c0_8 = arith.constant 0 : index
    %26 = vector.load %arg4[%c0_6, %c0_7, %c0_8] : memref<1x8x128xf32, #tpu.memory_space<vmem>>, vector<1x8x128xf32>
    %27 = vector.shape_cast %26 : vector<1x8x128xf32> to vector<8x128xf32>
    %28 = arith.addf %27, %23 : vector<8x128xf32>
    %c0_9 = arith.constant 0 : index
    %c0_10 = arith.constant 0 : index
    %c0_11 = arith.constant 0 : index
    %29 = vector.load %arg4[%c0_9, %c0_10, %c0_11] : memref<1x8x128xf32, #tpu.memory_space<vmem>>, vector<1x8x128xf32>
    %30 = vector.shape_cast %29 : vector<1x8x128xf32> to vector<8x128xf32>
    %31 = vector.shape_cast %28 : vector<8x128xf32> to vector<1x8x128xf32>
    tpu.vector_store %arg4[%c0_9, %c0_10, %c0_11], %31 {strides = array<i32>} : memref<1x8x128xf32, #tpu.memory_space<vmem>>, vector<1x8x128xf32>,
    %c0_12 = arith.constant 0 : index
    %c0_13 = arith.constant 0 : index
    %c0_14 = arith.constant 0 : index
    %32 = vector.load %arg5[%c0_12, %c0_13, %c0_14] : memref<1x8x128xf32, #tpu.memory_space<vmem>>, vector<1x8x128xf32>
    %33 = vector.shape_cast %32 : vector<1x8x128xf32> to vector<8x128xf32>
    %34 = arith.addf %33, %25 : vector<8x128xf32>
    %c0_15 = arith.constant 0 : index
    %c0_16 = arith.constant 0 : index
    %c0_17 = arith.constant 0 : index
    %35 = vector.load %arg5[%c0_15, %c0_16, %c0_17] : memref<1x8x128xf32, #tpu.memory_space<vmem>>, vector<1x8x128xf32>
    %36 = vector.shape_cast %35 : vector<1x8x128xf32> to vector<8x128xf32>
    %37 = vector.shape_cast %34 : vector<8x128xf32> to vector<1x8x128xf32>
    tpu.vector_store %arg5[%c0_15, %c0_16, %c0_17], %37 {strides = array<i32>} : memref<1x8x128xf32, #tpu.memory_space<vmem>>, vector<1x8x128xf32>,
    return
  }
  func.func @transform_0(%arg0: i32, %arg1: i32) -> (i32, i32) {
    %c1_i32 = arith.constant 1 : i32
    %0 = arith.muli %arg0, %c1_i32 : i32
    %1 = arith.addi %0, %arg1 : i32
    %c0_i32 = arith.constant 0 : i32
    %c0_i32_0 = arith.constant 0 : i32
    return %1, %c0_i32 : i32, i32
  }
  func.func @transform_1(%arg0: i32, %arg1: i32) -> (i32, i32) {
    %c1_i32 = arith.constant 1 : i32
    %0 = arith.muli %arg0, %c1_i32 : i32
    %1 = arith.addi %0, %arg1 : i32
    %c0_i32 = arith.constant 0 : i32
    %c0_i32_0 = arith.constant 0 : i32
    return %1, %c0_i32 : i32, i32
  }
  func.func @transform_2(%arg0: i32, %arg1: i32) -> (i32, i32, i32) {
    %c0_i32 = arith.constant 0 : i32
    %c0_i32_0 = arith.constant 0 : i32
    %c0_i32_1 = arith.constant 0 : i32
    return %arg0, %c0_i32, %c0_i32_0 : i32, i32, i32
  }
  func.func @transform_3(%arg0: i32, %arg1: i32) -> (i32, i32, i32) {
    %c0_i32 = arith.constant 0 : i32
    %c0_i32_0 = arith.constant 0 : i32
    %c0_i32_1 = arith.constant 0 : i32
    return %arg0, %c0_i32, %c0_i32_0 : i32, i32, i32
  }
}

</mosaic_0001>

<bundles_post_ra>
// kernel: tpu_custom_call.1
= control target key start
LH: loop header
LB: loop body
LE: loop exit
PB: predicated region body
PF: predicated region fallthrough
CT: control target
= control target key end

     0   :  { %9 = vsyncpa [#allocation3], 0  ;;  %s290_s0 = inlined_call_operand.hbm [shape: f32[16,128], index: 0, kind: input, shape index: {}]   ;;  %s291_s1 = inlined_call_operand.hbm [shape: f32[16,128], index: 1, kind: input, shape index: {}]   ;;  %s292_s2 = inlined_call_operand.hbm [shape: f32[1,8,128], index: 2, kind: output, shape index: {0}]   ;;  %s293_s3 = inlined_call_operand.hbm [shape: f32[1,8,128], index: 3, kind: output, shape index: {1}]  }
   0x1   :  { %10 = vsyncpa [#allocation6], 0 }
   0x2   :  { %11 = vsyncpa [#allocation4], 0 }
   0x3   :  { %12 = vsyncpa [#allocation9], 0  ;;  %s216_s12 = smov [#allocation2]   ;;  %s120_s16 = scalar_lea.hbm %s290_s0, 256 }
   0x4   :  { %s22_s13 = sshll.u32 %s216_s12, 4  ;;  %p121_p0 = scmp.ne.s32.totalorder %s290_s0, %s120_s16  ;;  %s23_s13 = int_to_ptr.vmem [resolvable:$true] %s22_s13 }
   0x5   :  { %p124_p1 = scmp.lt.u32.totalorder %s120_s16, %s290_s0 }
   0x7   :  { %p126_p2 = pnand %p124_p1, %p121_p0 }
   0x9   :  { %129 = shalt.err (!%p126_p2)
}
   0xa   :  { %s130_s21 = scalar_lea.vmem %s23_s13, 256  ;;  %p135_p4 = scmp.lt.s32.totalorder %s23_s13, %s23_s13 }
   0xb   :  { %p131_p3 = scmp.ne.s32.totalorder %s23_s13, %s130_s21  ;;  %p136_p5 = scmp.lt.s32.totalorder %s130_s21, %s130_s21 }
   0xd   :  { %p137_p6 = por %p136_p5, %p135_p4 }
   0xf   :  { %p138_p7 = pnand %p137_p6, %p131_p3 }
  0x11   :  { %141 = shalt.err (!%p138_p7)
}
  0x12   :  { %s217_s22 = smov 128   ;;  %s218_s23 = smov 8  }
  0x13   :  { %28 = dma.hbm_to_vmem [thread:$0]  %s290_s0, 256, %s23_s13, [#allocation3], %s217_s22, %s217_s22, %s218_s23  }
  0x14   :  { %s219_s26 = smov [#allocation5]   ;;  %s142_s30 = scalar_lea.hbm %s291_s1, 256 }
  0x15   :  { %s38_s27 = sshll.u32 %s219_s26, 4  ;;  %p143_p8 = scmp.ne.s32.totalorder %s291_s1, %s142_s30  ;;  %s39_s27 = int_to_ptr.vmem [resolvable:$true] %s38_s27 }
  0x16   :  { %p146_p9 = scmp.lt.u32.totalorder %s142_s30, %s291_s1 }
  0x18   :  { %p148_p10 = pnand %p146_p9, %p143_p8 }
  0x1a   :  { %151 = shalt.err (!%p148_p10)
}
  0x1b   :  { %s152_s8 = scalar_lea.vmem %s39_s27, 256  ;;  %p157_p12 = scmp.lt.s32.totalorder %s39_s27, %s39_s27 }
  0x1c   :  { %p153_p11 = scmp.ne.s32.totalorder %s39_s27, %s152_s8  ;;  %p158_p13 = scmp.lt.s32.totalorder %s152_s8, %s152_s8 }
  0x1e   :  { %p159_p0 = por %p158_p13, %p157_p12 }
  0x20   :  { %p160_p1 = pnand %p159_p0, %p153_p11 }
  0x22   :  { %163 = shalt.err (!%p160_p1)
}
  0x23   :  { %44 = dma.hbm_to_vmem [thread:$0]  %s291_s1, 256, %s39_s27, [#allocation6], %s217_s22, %s217_s22, %s218_s23  }
  0x24   :  { %208 = dma.done.wait [#allocation3], 256  }
  0x25   :  { %209 = vsyncadd [#allocation3], 4294967040 }
  0x26   :  { %210 = dma.done.wait [#allocation6], 256  }
  0x27   :  { %211 = vsyncadd [#allocation6], 4294967040  ;;  %v61_v0 = vld [vmem:[#allocation2] sm:$0xff]  ;;  %v62_v1 = vld [vmem:[#allocation5] sm:$0xff]  ;;  %s220_s10 = smov [#allocation7]   ;;  %s221_s12 = smov [#allocation8]  }
  0x28   :  { %v69_v2 = vld [vmem:[#allocation2 + $0x8] sm:$0xff]  ;;  %v63_v3 = vsub.f32 %v61_v0, %v62_v1  ;;  %v71_v4 = vld [vmem:[#allocation5 + $0x8] sm:$0xff]  ;;  %s89_s11 = sshll.u32 %s220_s10, 4  ;;  %s99_s1 = sshll.u32 %s221_s12, 4  ;;  %s90_s11 = int_to_ptr.vmem [resolvable:$true] %s89_s11  ;;  %s100_s1 = int_to_ptr.vmem [resolvable:$true] %s99_s1 }
  0x29   :  { %v72_v5 = vsub.f32 %v69_v2, %v71_v4  ;;  %s164_s13 = scalar_lea.vmem %s90_s11, 128  ;;  %p169_p3 = scmp.lt.s32.totalorder %s90_s11, %s90_s11 }
  0x2a   :  { %v64_v6 = vmul.f32 %v63_v3, %v63_v3  ;;  %v66_v7 = vand.u32 2147483647, %v63_v3  ;;  %p165_p2 = scmp.ne.s32.totalorder %s90_s11, %s164_s13  ;;  %p170_p4 = scmp.lt.s32.totalorder %s164_s13, %s164_s13 }
  0x2b   :  { %v73_v8 = vmul.f32 %v72_v5, %v72_v5  ;;  %v75_v9 = vand.u32 2147483647, %v72_v5 }
  0x2c   :  { %p171_p5 = por %p170_p4, %p169_p3 }
  0x2d   :  { %v74_v10 = vadd.f32 %v73_v8, %v64_v6  ;;  %v76_v11 = vadd.f32 %v75_v9, %v66_v7 }
  0x2e   :  { %p172_p6 = pnand %p171_p5, %p165_p2 }
  0x2f   :  { %79 = vst [vmem:[#allocation7] sm:$0xff] %v74_v10  ;;  %82 = vst [vmem:[#allocation8] sm:$0xff] %v76_v11 }
  0x30   :  { %175 = shalt.err (!%p172_p6)
}
  0x31   :  { %s176_s16 = scalar_lea.hbm %s292_s2, 128 }
  0x32   :  { %p177_p7 = scmp.ne.s32.totalorder %s292_s2, %s176_s16  ;;  %p180_p8 = scmp.lt.u32.totalorder %s176_s16, %s292_s2 }
  0x34   :  { %p182_p9 = pnand %p180_p8, %p177_p7 }
  0x36   :  { %185 = shalt.err (!%p182_p9)
}
  0x37   :  { %92 = dma.vmem_to_hbm [thread:$0]  %s90_s11, 128, %s292_s2, [#allocation4]  }
  0x38   :  { %s186_s23 = scalar_lea.vmem %s100_s1, 128  ;;  %p191_p11 = scmp.lt.s32.totalorder %s100_s1, %s100_s1 }
  0x39   :  { %p187_p10 = scmp.ne.s32.totalorder %s100_s1, %s186_s23  ;;  %p192_p12 = scmp.lt.s32.totalorder %s186_s23, %s186_s23 }
  0x3b   :  { %p193_p13 = por %p192_p12, %p191_p11 }
  0x3d   :  { %p194_p0 = pnand %p193_p13, %p187_p10 }
  0x3f   :  { %197 = shalt.err (!%p194_p0)
}
  0x40   :  { %s198_s26 = scalar_lea.hbm %s293_s3, 128 }
  0x41   :  { %p199_p1 = scmp.ne.s32.totalorder %s293_s3, %s198_s26  ;;  %p202_p2 = scmp.lt.u32.totalorder %s198_s26, %s293_s3 }
  0x43   :  { %p204_p3 = pnand %p202_p2, %p199_p1 }
  0x45   :  { %207 = shalt.err (!%p204_p3)
}
  0x46   :  { %102 = dma.vmem_to_hbm [thread:$0]  %s100_s1, 128, %s293_s3, [#allocation9]  }
  0x47   :  { %212 = dma.done.wait [#allocation4], 128  }
  0x48   :  { %213 = vsyncadd [#allocation4], 4294967168 }
  0x49   :  { %214 = dma.done.wait [#allocation9], 128  }
  0x4a   :  { %215 = vsyncadd [#allocation9], 4294967168 }
  0x4b   :  { %109 = vsyncpa [#allocation3], 1 }
  0x4c   :  { %110 = vsyncpa [#allocation6], 1 }
  0x4d   :  { %111 = vsyncpa [#allocation4], 1 }
  0x4e   :  { %112 = vsyncpa [#allocation9], 1 }

</bundles_post_ra>
